<compile_context>
chip_gen: v7x
topology: tpu7x:2x2x1
jax: 0.10.0
libtpu: 0.0.40
codegen_flags: <defaults>
</compile_context>

<pallas_src>
import functools
import math

import jax
import jax.numpy as jnp
from jax.experimental import pallas as pl
from jax.experimental.pallas import tpu as pltpu


def _round_up(x, m):
    return ((x + m - 1) // m) * m


def _prenet_kernel(x_ref, *rest, num_layers, use_masks):
    """Fused Prenet forward for one row tile.

    x_ref : VMEM (tN, idim)
    rest  : num_layers weight refs (in_i, units),
            then (if use_masks) num_layers mask refs (tN, units) holding
            pre-scaled keep values {0, 1/(1-p)},
            then o_ref (tN, units).
    """
    w_refs = rest[:num_layers]
    if use_masks:
        m_refs = rest[num_layers:2 * num_layers]
        o_ref = rest[2 * num_layers]
    else:
        m_refs = (None,) * num_layers
        o_ref = rest[num_layers]

    h = x_ref[...]
    for w_ref, m_ref in zip(w_refs, m_refs):
        # MXU matmul in the streamed dtype (bf16 fast path if bf16), f32 acc.
        h = jnp.dot(h.astype(w_ref.dtype), w_ref[...],
                    preferred_element_type=jnp.float32)
        # ReLU on the VPU in f32.
        h = jnp.maximum(h, 0.0)
        if m_ref is not None:
            # Inverted dropout: mask already carries the 1/(1-p) scale.
            h = h * m_ref[...].astype(jnp.float32)
    o_ref[...] = h.astype(o_ref.dtype)


def prenet_forward(x, weights, *, dropout_p=0.5, train=False, rng=None,
                   block_rows=1024, compute_dtype=None):
    """JAX/Pallas equivalent of Prenet.forward.

    x:             [..., idim]
    weights:       list of [in_dim, out_dim] matrices (TRANSPOSE of torch
                   nn.Linear.weight, since Linear(x) = x @ W.T, no bias)
    train:         if True, apply inverted dropout with probability
                   `dropout_p` using host-generated jax.random masks
                   (reproducible given `rng`); if False (eval), dropout is
                   the identity, as in nn.Dropout.
    compute_dtype: dtype streamed into the MXU for x / weights / masks
                   (e.g. jnp.bfloat16 to halve HBM traffic).  None -> x.dtype.
                   Accumulation is always f32; output dtype is x.dtype.
    """
    num_layers = len(weights)
    idim = weights[0].shape[0]
    units = weights[-1].shape[1]
    assert x.shape[-1] == idim, (x.shape, idim)

    out_dtype = x.dtype
    if compute_dtype is None:
        compute_dtype = x.dtype
    compute_dtype = jnp.dtype(compute_dtype)

    lead = x.shape[:-1]
    x2 = x.reshape(-1, idim).astype(compute_dtype)
    n = x2.shape[0]
    weights = [jnp.asarray(w).astype(compute_dtype) for w in weights]

    # Row tile: sublane-aligned, capped at block_rows, and capped so the
    # grid has >= 2 steps (keeps both v7x TensorCores busy via "parallel").
    tn = min(_round_up(block_rows, 8), _round_up(n, 8))
    if n > 8:
        tn = min(tn, _round_up(pl.cdiv(n, 2), 8))
    tn = max(8, tn)
    grid = (pl.cdiv(n, tn),)   # ragged last block: Pallas masks its writes

    # Host-side dropout masks (inverted dropout, scale folded in).
    apply_dropout = bool(train) and float(dropout_p) > 0.0
    masks = []
    if apply_dropout:
        if rng is None:
            rng = jax.random.PRNGKey(0)
        keep_p = 1.0 - float(dropout_p)
        scale = 0.0 if keep_p <= 0.0 else 1.0 / keep_p
        keys = jax.random.split(rng, num_layers)
        for k, w in zip(keys, weights):
            keep = jax.random.bernoulli(k, keep_p, (n, w.shape[1]))
            masks.append(keep.astype(compute_dtype) * jnp.asarray(
                scale, dtype=compute_dtype))

    # BlockSpecs: x / masks / out tiled over rows; weights VMEM-resident.
    in_specs = [pl.BlockSpec((tn, idim), lambda i: (i, 0))]
    for w in weights:
        wi, wo = w.shape
        in_specs.append(pl.BlockSpec((wi, wo), lambda i: (0, 0)))
    for m in masks:
        in_specs.append(pl.BlockSpec((tn, m.shape[1]), lambda i: (i, 0)))
    out_specs = pl.BlockSpec((tn, units), lambda i: (i, 0))

    # Advisory cost estimate: low-flop, bandwidth-heavy.
    flops = 2 * n * sum(int(w.shape[0]) * int(w.shape[1]) for w in weights)
    bytes_accessed = (
        x2.size * x2.dtype.itemsize
        + sum(int(w.size) * w.dtype.itemsize for w in weights)
        + sum(int(m.size) * m.dtype.itemsize for m in masks)
        + n * units * jnp.dtype(out_dtype).itemsize
    )
    cost = pl.CostEstimate(flops=flops, transcendentals=0,
                           bytes_accessed=bytes_accessed)

    kernel = functools.partial(
        _prenet_kernel,
        num_layers=num_layers,
        use_masks=apply_dropout,
    )

    out = pl.pallas_call(
        kernel,
        out_shape=jax.ShapeDtypeStruct((n, units), out_dtype),
        grid_spec=pltpu.PrefetchScalarGridSpec(
            num_scalar_prefetch=0,
            grid=grid,
            in_specs=in_specs,
            out_specs=out_specs,
        ),
        compiler_params=pltpu.CompilerParams(
            dimension_semantics=("parallel",),  # row tiles are independent
        ),
        cost_estimate=cost,
    )(x2, *weights, *masks)

    return out.reshape(*lead, units)


def _reference_eval(x, weights):
    """Pure-JAX reference of the eval-mode forward (dropout = identity)."""
    h = x.astype(jnp.float32)
    for w in weights:
        h = jnp.maximum(
            jnp.dot(h, w.astype(jnp.float32),
                    precision=jax.lax.Precision.HIGHEST),
            0.0,
        )
    return h.astype(x.dtype)


if __name__ == "__main__":
    key = jax.random.PRNGKey(0)
    kx, k1, k2, kd = jax.random.split(key, 4)

    # Shapes consistent with the module: Prenet(idim=80, units=128,
    # num_layers=2) applied to a [B, T, idim] sequence.
    B, T, idim, units = 2, 16, 80, 128
    x = jax.random.normal(kx, (B, T, idim), dtype=jnp.float32)
    w1 = jax.random.normal(k1, (idim, units), dtype=jnp.float32) / math.sqrt(idim)
    w2 = jax.random.normal(k2, (units, units), dtype=jnp.float32) / math.sqrt(units)
    weights = [w1, w2]

    # 1) Eval-mode forward (dropout off), f32 path — exact-ish check.
    out = prenet_forward(x, weights, dropout_p=0.5, train=False)
    out = jax.block_until_ready(out)
    ref = _reference_eval(x, weights)
    assert out.shape == ref.shape == (B, T, units), (out.shape, ref.shape)
    assert jnp.allclose(out, ref, atol=2e-3, rtol=2e-3), "f32 mismatch vs reference"

    # 2) Ragged row count (n = 21, not tile-aligned) — exercises the
    #    no-pad / masked-last-block path.
    xr = jax.random.normal(kd, (3, 7, idim), dtype=jnp.float32)
    out_r = jax.block_until_ready(
        prenet_forward(xr, weights, dropout_p=0.5, train=False))
    ref_r = _reference_eval(xr, weights)
    assert out_r.shape == (3, 7, units)
    assert jnp.allclose(out_r, ref_r, atol=2e-3, rtol=2e-3), "ragged mismatch"

    # 3) bf16-streaming eval path (halved HBM bytes) — loose tolerance.
    out_bf16 = jax.block_until_ready(
        prenet_forward(x, weights, dropout_p=0.5, train=False,
                       compute_dtype=jnp.bfloat16))
    assert out_bf16.shape == (B, T, units)
    assert jnp.allclose(out_bf16, ref, atol=1e-1, rtol=1e-1), "bf16 mismatch"

    # 4) Training-mode forward (host-generated dropout masks) — smoke +
    #    determinism check.
    rng = jax.random.PRNGKey(1234)
    out_tr = jax.block_until_ready(
        prenet_forward(x, weights, dropout_p=0.5, train=True, rng=rng))
    out_tr2 = jax.block_until_ready(
        prenet_forward(x, weights, dropout_p=0.5, train=True, rng=rng))
    assert out_tr.shape == (B, T, units)
    assert bool(jnp.all(jnp.isfinite(out_tr)))
    assert jnp.array_equal(out_tr, out_tr2), "dropout not deterministic per rng"

    print("KERNEL_OK")
</pallas_src>

<mosaic_0001>
module attributes {stable_mosaic.version = 11 : i64} {
  func.func @_prenet_kernel(%arg0: i32, %arg1: memref<16x80xf32, #tpu.memory_space<vmem>>, %arg2: memref<80x128xf32, #tpu.memory_space<vmem>>, %arg3: memref<128x128xf32, #tpu.memory_space<vmem>>, %arg4: memref<16x128xf32, #tpu.memory_space<vmem>>) attributes {dimension_semantics = [#tpu.dimension_semantics<parallel>], iteration_bounds = array<i64: 2>, scalar_prefetch = 0 : i64, scratch_operands = 0 : i64, tpu.core_type = #tpu.core_type<tc>, window_params = [{transform_indices = @transform_0, window_bounds = array<i64: 16, 80>}, {pipeline_mode = #tpu.pipeline_mode<synchronous>, transform_indices = @transform_1, window_bounds = array<i64: 80, 128>}, {pipeline_mode = #tpu.pipeline_mode<synchronous>, transform_indices = @transform_2, window_bounds = array<i64: 128, 128>}, {transform_indices = @transform_3, window_bounds = array<i64: 16, 128>}]} {
    %c0 = arith.constant 0 : index
    %c0_0 = arith.constant 0 : index
    %0 = vector.load %arg1[%c0, %c0_0] : memref<16x80xf32, #tpu.memory_space<vmem>>, vector<16x80xf32>
    %c0_1 = arith.constant 0 : index
    %c0_2 = arith.constant 0 : index
    %1 = vector.load %arg2[%c0_1, %c0_2] : memref<80x128xf32, #tpu.memory_space<vmem>>, vector<80x128xf32>
    %cst = arith.constant dense<0.000000e+00> : vector<16x128xf32>
    %2 = tpu.matmul %0, %1, %cst {dimension_numbers = #tpu.dot_dimension_numbers<[1], [0], [0], [1], [0, 0, 1, 1], [], []>} : vector<16x80xf32>, vector<80x128xf32>, vector<16x128xf32> -> vector<16x128xf32>
    %cst_3 = arith.constant 0.000000e+00 : f32
    %3 = vector.broadcast %cst_3 : f32 to vector<16x128xf32>
    %4 = arith.maximumf %2, %3 : vector<16x128xf32>
    %c0_4 = arith.constant 0 : index
    %c0_5 = arith.constant 0 : index
    %5 = vector.load %arg3[%c0_4, %c0_5] : memref<128x128xf32, #tpu.memory_space<vmem>>, vector<128x128xf32>
    %cst_6 = arith.constant dense<0.000000e+00> : vector<16x128xf32>
    %6 = tpu.matmul %4, %5, %cst_6 {dimension_numbers = #tpu.dot_dimension_numbers<[1], [0], [0], [1], [0, 0, 1, 1], [], []>} : vector<16x128xf32>, vector<128x128xf32>, vector<16x128xf32> -> vector<16x128xf32>
    %cst_7 = arith.constant 0.000000e+00 : f32
    %7 = vector.broadcast %cst_7 : f32 to vector<16x128xf32>
    %8 = arith.maximumf %6, %7 : vector<16x128xf32>
    %c0_8 = arith.constant 0 : index
    %c0_9 = arith.constant 0 : index
    %9 = vector.load %arg4[%c0_8, %c0_9] : memref<16x128xf32, #tpu.memory_space<vmem>>, vector<16x128xf32>
    tpu.vector_store %arg4[%c0_8, %c0_9], %8 {strides = array<i32>} : memref<16x128xf32, #tpu.memory_space<vmem>>, vector<16x128xf32>,
    return
  }
  func.func @transform_0(%arg0: i32) -> (i32, i32) {
    %c0_i32 = arith.constant 0 : i32
    %c0_i32_0 = arith.constant 0 : i32
    return %arg0, %c0_i32 : i32, i32
  }
  func.func @transform_1(%arg0: i32) -> (i32, i32) {
    %c0_i32 = arith.constant 0 : i32
    %c0_i32_0 = arith.constant 0 : i32
    %c0_i32_1 = arith.constant 0 : i32
    return %c0_i32, %c0_i32_0 : i32, i32
  }
  func.func @transform_2(%arg0: i32) -> (i32, i32) {
    %c0_i32 = arith.constant 0 : i32
    %c0_i32_0 = arith.constant 0 : i32
    %c0_i32_1 = arith.constant 0 : i32
    return %c0_i32, %c0_i32_0 : i32, i32
  }
  func.func @transform_3(%arg0: i32) -> (i32, i32) {
    %c0_i32 = arith.constant 0 : i32
    %c0_i32_0 = arith.constant 0 : i32
    return %arg0, %c0_i32 : i32, i32
  }
}

</mosaic_0001>

<bundles_post_ra>
// kernel: tpu_custom_call.1
= control target key start
LH: loop header
LB: loop body
LE: loop exit
PB: predicated region body
PF: predicated region fallthrough
CT: control target
= control target key end

     0   :  { %8 = vsyncpa [#allocation3], 0  ;;  %s1189_s0 = inlined_call_operand.hbm [shape: f32[32,80], index: 0, kind: input, shape index: {}]   ;;  %s1190_s1 = inlined_call_operand.hbm [shape: f32[80,128], index: 1, kind: input, shape index: {}]   ;;  %s1191_s2 = inlined_call_operand.hbm [shape: f32[128,128], index: 2, kind: input, shape index: {}]   ;;  %s1192_s3 = inlined_call_operand.hbm [shape: f32[32,128], index: 3, kind: output, shape index: {}]  }
   0x1   :  { %10 = vsyncpa [#allocation3 + $0x1], 0 }
   0x2   :  { %11 = vsyncpa [#allocation6], 0 }
   0x3   :  { %12 = vsyncpa [#allocation4], 0 }
   0x4   :  { %14 = vsyncpa [#allocation4 + $0x1], 0  ;;  %s936_s12 = smov 0   ;;  %s938_s13 = smov 0  }
   0x5   :  { %s940_s14 = smov 0   ;;  %s942_s15 = smov 0  }
   0x6 LB: > { %s957_s16 = sadd.s32 4294967295, %s906_s15   ;;  %s517_s17 = sadd.s32 4294967294, %s906_s15   ;;  %s906_s15 = sphi %s942_s15, %s1212_s15   ;;  %s902_s14 = sphi %s940_s14, %s1211_s14   ;;  %s898_s13 = sphi %s938_s13, %s1210_s13   ;;  %s894_s12 = sphi %s936_s12, %s1209_s12  }
   0x7   : > { %p40_p0 = scmp.ne.s32.totalorder %s898_s13, %s894_s12  ;;  %p1193_p1 = scmp.eq.s32.totalorder %s957_s16, 0 }
   0x8   : > { %p112_p3 = scmp.eq.s32.totalorder %s517_s17, 1  ;;  %p518_p5 = scmp.ge.s32.totalorder %s906_s15, 1 }
   0x9   : > { %p966_p4 = por %p1193_p1, %p40_p0  ;;  %p119_p7 = scmp.lt.s32.totalorder %s906_s15, 3 }
   0xa   : > { %p971_p6 = por %p112_p3, %p40_p0  ;;  %s908_s21 = smov [#allocation5]  }
   0xb   : > { %s1196_s18 = scalar_select %p966_p4, 1, 0 }
   0xc   : > { %s1197_s19 = scalar_select %p971_p6, 1, 0 }
   0xd   : > { %p976_p8 = pnand %p518_p5, %p119_p7  ;;  %s131_s22 = sshll.u32 %s908_s21, 4  ;;  %s980_s22 = int_to_ptr.vmem [resolvable:$true] %s131_s22 }
   0xe   : > { %s909_s24 = smov [#allocation7]   ;;  %s750_s28 = scalar_lea.hbm %s1190_s1, 1280 }
   0xf   : > { %p691_p9 = pneg %p976_p8  ;;  %s144_s25 = sshll.u32 %s909_s24, 4  ;;  %s991_s25 = int_to_ptr.vmem [resolvable:$true] %s144_s25 }
  0x10   : > { %p751_p12 = scmp.ne.s32.totalorder %s1190_s1, %s750_s28  ;;  %p757_p5 = scmp.lt.u32.totalorder %s750_s28, %s1190_s1 }
  0x11   : > { %p987_p11 = pnand %p691_p9, %p1193_p1 }
  0x13   : > { %p752_p13 = pneg %p987_p11 }
  0x15   : > { %p753_p0 = pnand %p752_p13, %p751_p12 }
  0x17   : > { %p754_p3 = pneg %p753_p0 }
  0x19   : > { %p759_p7 = pnand %p757_p5, %p754_p3 }
  0x1b   : > { %762 = shalt.err (!%p759_p7)
}
  0x1c   : > { %s763_s6 = scalar_lea.vmem %s980_s22, 1280  ;;  %p771_p2 = scmp.lt.s32.totalorder %s980_s22, %s980_s22 }
  0x1d   : > { %p764_p9 = scmp.ne.s32.totalorder %s980_s22, %s763_s6  ;;  %p772_p12 = scmp.lt.s32.totalorder %s763_s6, %s763_s6 }
  0x1f   : > { %p766_p10 = pnand %p764_p9, %p752_p13  ;;  %p773_p0 = por %p772_p12, %p771_p2 }
  0x21   : > { %p767_p1 = pneg %p766_p10 }
  0x23   : > { %p774_p6 = pnand %p773_p0, %p767_p1 }
  0x25   : > { %777 = shalt.err (!%p774_p6)
}
  0x26   : > { %s910_s7 = smov 128   ;;  %s911_s8 = smov 8  }
  0x27   : > { %694 = dma.hbm_to_vmem [thread:$0]  (!%p987_p11), %s1190_s1, 1280, %s980_s22, [#allocation6], %s910_s7, %s910_s7, %s911_s8  }
  0x28   : > { %s778_s21 = scalar_lea.hbm %s1191_s2, 2048 }
  0x29   : > { %p779_p1 = scmp.ne.s32.totalorder %s1191_s2, %s778_s21  ;;  %p785_p10 = scmp.lt.u32.totalorder %s778_s21, %s1191_s2 }
  0x2b   : > { %p781_p2 = pnand %p779_p1, %p752_p13 }
  0x2d   : > { %p782_p6 = pneg %p781_p2 }
  0x2f   : > { %p787_p3 = pnand %p785_p10, %p782_p6 }
  0x31   : > { %790 = shalt.err (!%p787_p3)
}
  0x32   : > { %s791_s22 = scalar_lea.vmem %s991_s25, 2048  ;;  %p799_p12 = scmp.lt.s32.totalorder %s991_s25, %s991_s25 }
  0x33   : > { %p792_p5 = scmp.ne.s32.totalorder %s991_s25, %s791_s22  ;;  %p800_p0 = scmp.lt.s32.totalorder %s791_s22, %s791_s22 }
  0x35   : > { %p794_p7 = pnand %p792_p5, %p752_p13  ;;  %p801_p1 = por %p800_p0, %p799_p12 }
  0x37   : > { %p795_p9 = pneg %p794_p7 }
  0x39   : > { %p802_p2 = pnand %p801_p1, %p795_p9 }
  0x3b   : > { %805 = shalt.err (!%p802_p2)
}
  0x3c   : > { %697 = dma.hbm_to_vmem [thread:$0]  (!%p987_p11), %s1191_s2, 2048, %s991_s25, [#allocation6], %s910_s7, %s910_s7, %s911_s8  }
  0x3d   : > { %s1052_s23 = sadd.s32 1, %s906_s15   ;;  %s27_s4 = sadd.s32 1, %s902_s14 }
  0x3e   : > { %s24_s5 = ssub.s32 %s906_s15, %s1052_s23  ;;  %p34_p13 = scmp.ne.s32.totalorder %s902_s14, %s898_s13 }
  0x3f   : > { %p25_p6 = scmp.eq.s32.totalorder %s24_s5, 0  ;;  %p35_p10 = scmp.eq.s32.totalorder %s906_s15, 0 }
  0x40   : > { %p1200_p3 = scmp.eq.s32.totalorder %s957_s16, 1  ;;  %p708_p7 = scmp.lt.s32.totalorder %s906_s15, 2 }
  0x41   : > { %s1068_s9 = scalar_select %p25_p6, %s902_s14, %s27_s4  }
  0x42   : > { %p1062_p5 = por %p1200_p3, %p34_p13  ;;  %p36_p9 = por %p35_p10, %p34_p13 }
  0x43   : > { %s158_s10 = sand.u32 1, %s902_s14   ;;  %s537_s25 = sshll.u32 %s906_s15, 8 }
  0x44   : > { %s1201_s6 = scalar_select %p1062_p5, 1, 0 }
  0x45   : > { %s522_s11 = sshll.u32 %s158_s10, 4  ;;  %s1075_s24 = scalar_lea.hbm %s1189_s0, %s537_s25 }
  0x46   : > { %s162_s26 = scalar_lea.vmem [#allocation2], %s522_s11  ;;  %p1079_p11 = pnand %p708_p7, %p36_p9 }
  0x47   : > { %s169_s27 = sshll.u32 %s162_s26, 4  ;;  %s1083_s22 = scalar_lea.sflag [#allocation3], %s158_s10  ;;  %s1077_s27 = int_to_ptr.vmem [resolvable:$true] %s169_s27 }
  0x48   : > { %s806_s29 = scalar_lea.hbm %s1075_s24, 256  ;;  %p808_p0 = pneg %p1079_p11 }
  0x49   : > { %p807_p12 = scmp.ne.s32.totalorder %s1075_s24, %s806_s29  ;;  %s811_s5 = scalar_lea.hbm %s1189_s0, 512 }
  0x4a   : > { %p812_p13 = scmp.lt.u32.totalorder %s1075_s24, %s1189_s0  ;;  %p813_p6 = scmp.lt.u32.totalorder %s811_s5, %s806_s29 }
  0x4b   : > { %p809_p1 = pnand %p808_p0, %p807_p12  ;;  %p815_p3 = scmp.lt.u32.totalorder %s806_s29, %s1075_s24 }
  0x4c   : > { %p814_p10 = por %p813_p6, %p812_p13 }
  0x4d   : > { %p810_p2 = pneg %p809_p1 }
  0x4e   : > { %p816_p7 = por %p815_p3, %p814_p10 }
  0x50   : > { %p817_p9 = pnand %p816_p7, %p810_p2 }
  0x52   : > { %820 = shalt.err (!%p817_p9)
}
  0x53   : > { %s821_s10 = scalar_lea.vmem %s1077_s27, 256  ;;  %s912_s17 = smov [#allocation2]  }
  0x54   : > { %p822_p12 = scmp.ne.s32.totalorder %s1077_s27, %s821_s10  ;;  %s826_s21 = sshll.u32 %s912_s17, 4  ;;  %s827_s21 = int_to_ptr.vmem [resolvable:$false] %s826_s21 }
  0x55   : > { %s828_s26 = scalar_lea.vmem %s827_s21, 512  ;;  %p829_p4 = scmp.lt.s32.totalorder %s1077_s27, %s827_s21 }
  0x56   : > { %p824_p1 = pnand %p822_p12, %p808_p0  ;;  %p830_p13 = scmp.lt.s32.totalorder %s828_s26, %s821_s10 }
  0x58   : > { %p825_p5 = pneg %p824_p1  ;;  %p831_p6 = por %p830_p13, %p829_p4 }
  0x5a   : > { %p832_p10 = pnand %p831_p6, %p825_p5 }
  0x5c   : > { %835 = shalt.err (!%p832_p10)
}
  0x5d   : > { %701 = dma.hbm_to_vmem [thread:$0]  (!%p1079_p11), %s1075_s24, 256, %s1077_s27, %s1083_s22, %s910_s7, %s910_s7, %s911_s8  }
  0x5e   : > { %181 = sbr.rel (%p976_p8) target bundleno = 574 (0x23e), region = 32  ;;  %s1117_s29 = sand.u32 (!%p976_p8), 1, %s898_s13  }
  0x5f   : > { %s526_s30 = sshll.u32 (!%p976_p8), %s1117_s29, 4  ;;  %s184_s4 = scalar_lea.sflag (!%p976_p8), [#allocation3], %s1117_s29 }
  0x60   : > { %s1123_s28 = scalar_lea.vmem (!%p976_p8), [#allocation2], %s526_s30  ;;  %p1203_p4 = scmp.ne.s32.totalorder (!%p976_p8), %s1196_s18, 0 }
  0x65   : > { %881 = dma.done.wait (%p1203_p4), %s184_s4, 256  }
  0x66   : > { %883 = vsyncadd (%p1203_p4), %s184_s4, 4294967040  ;;  %p1204_p5 = scmp.eq.s32.totalorder %s957_s16, 0 }
  0x68   : > { %885 = dma.done.wait (%p1204_p5), [#allocation6], 3328   ;;  %p1205_p8 = pmov %p1204_p5 }
  0x69   : > { %v222_v0 = vld [vmem:[#allocation5] sm:$0xff]  ;;  %v223_v1 = vld [vmem:[#allocation5 + $0x8] sm:$0xff]  ;;  %v224_v2 = vld [vmem:[#allocation5 + $0x10] sm:$0xff]  ;;  %vm232_vm0 = vcmask 654336   ;;  %s217_s18 = scalar_lea.vmem [#allocation8], %s526_s30  ;;  %s538_s7 = sshll.u32 %s957_s16, 8 }
  0x6a   : > { %887 = vsyncadd (%p1205_p8), [#allocation6], 4294963968  ;;  %v627_v3 = vpack.c.bf16 %v223_v1, %v222_v0  ;;  %v225_v4 = vld [vmem:[#allocation5 + $0x18] sm:$0xff]  ;;  %v226_v6 = vld [vmem:[#allocation5 + $0x20] sm:$0xff]  ;;  %s425_s20 = sshll.u32 %s217_s18, 4  ;;  %s1145_s27 = scalar_lea.hbm %s1192_s3, %s538_s7  ;;  %s1140_s20 = int_to_ptr.vmem [resolvable:$true] %s425_s20 }
  0x6b   : > { %v631_v5 = vpack.c.bf16 %v225_v4, %v224_v2  ;;  %v227_v7 = vld [vmem:[#allocation5 + $0x28] sm:$0xff]  ;;  %v220_v8 = vld [vmem:[%s1123_s28] sm:$0xff]  ;;  %v317_v10 = vld [vmem:[#allocation7 + $0x8] sm:$0xff]  ;;  %s412_s22 = scalar_lea.sflag [#allocation4], %s1117_s29  ;;  %s836_s5 = scalar_lea.vmem %s1140_s20, 256 }
  0x6c   : > { %628 = vmatprep.subr.bf16.mxu0 %v627_v3  ;;  %589 = vmatprep.mubr.msk.f32.mxu0 %vm232_vm0, %v220_v8  ;;  %v316_v9 = vld [vmem:[#allocation7] sm:$0xff]  ;;  %v318_v11 = vld [vmem:[#allocation7 + $0x10] sm:$0xff]  ;;  %v635_v12 = vpack.c.bf16 %v227_v7, %v226_v6  ;;  %v319_v15 = vld [vmem:[#allocation7 + $0x18] sm:$0xff]  ;;  %p837_p11 = scmp.ne.s32.totalorder %s1140_s20, %s836_s5  ;;  %p1206_p0 = scmp.ne.s32.totalorder %s1201_s6, 0 }
  0x6d   : > { %630 = vmatpush3.bf16.msra.mxu0 %v627_v3  ;;  %v228_v13 = vld [vmem:[#allocation5 + $0x30] sm:$0xff]  ;;  %v647_v14 = vpack.c.bf16 %v317_v10, %v316_v9  ;;  %v229_v16 = vld [vmem:[#allocation5 + $0x38] sm:$0xff]  ;;  %v651_v17 = vpack.c.bf16 %v319_v15, %v318_v11  ;;  %v230_v21 = vld [vmem:[#allocation5 + $0x40] sm:$0xff]  ;;  %s913_s16 = smov [#allocation8]  }
  0x6e   : > { %632 = vmatprep.subr.bf16.mxu0 %v631_v5  ;;  %v320_v18 = vld [vmem:[#allocation7 + $0x20] sm:$0xff]  ;;  %v321_v19 = vld [vmem:[#allocation7 + $0x28] sm:$0xff]  ;;  %v639_v20 = vpack.c.bf16 %v229_v16, %v228_v13  ;;  %v231_v23 = vld [vmem:[#allocation5 + $0x48] sm:$0xff]  ;;  %p838_p2 = pnand %p837_p11, %p1206_p0  ;;  %s840_s11 = sshll.u32 %s913_s16, 4  ;;  %s841_s11 = int_to_ptr.vmem [resolvable:$false] %s840_s11 }
  0x6f   : > { %648 = vmatprep.subr.bf16.mxu1 %v647_v14  ;;  %v655_v22 = vpack.c.bf16 %v321_v19, %v320_v18  ;;  %v322_v24 = vld [vmem:[#allocation7 + $0x30] sm:$0xff]  ;;  %v323_v25 = vld [vmem:[#allocation7 + $0x38] sm:$0xff]  ;;  %v643_v26 = vpack.c.bf16 %v231_v23, %v230_v21  ;;  %v324_v28 = vld [vmem:[#allocation7 + $0x40] sm:$0xff]  ;;  %s842_s25 = scalar_lea.vmem %s841_s11, 512  ;;  %p843_p7 = scmp.lt.s32.totalorder %s1140_s20, %s841_s11 }
  0x70   : > { %650 = vmatpush3.bf16.msra.mxu1 %v647_v14  ;;  %v659_v27 = vpack.c.bf16 %v323_v25, %v322_v24  ;;  %v325_v29 = vld [vmem:[#allocation7 + $0x48] sm:$0xff]  ;;  %v326_v31 = vld [vmem:[#allocation7 + $0x50] sm:$0xff]  ;;  %v327_v32 = vld [vmem:[#allocation7 + $0x58] sm:$0xff]  ;;  %p839_p3 = pneg %p838_p2  ;;  %p844_p9 = scmp.lt.s32.totalorder %s842_s25, %s836_s5 }
  0x71   : > { %634 = vmatpush3.bf16.msra.mxu0 %v631_v5  ;;  %652 = vmatprep.subr.bf16.mxu1 %v651_v17  ;;  %v663_v30 = vpack.c.bf16 %v325_v29, %v324_v28  ;;  %v221_v33 = vld [vmem:[%s1123_s28 + $0x8] sm:$0xff]  ;;  %v667_v34 = vpack.c.bf16 %v327_v32, %v326_v31  ;;  %v328_v35 = vld [vmem:[#allocation7 + $0x60] sm:$0xff]  ;;  %v330_v38 = vld [vmem:[#allocation7 + $0x70] sm:$0xff] }
  0x72   : > { %636 = vmatprep.subr.bf16.mxu0 %v635_v12  ;;  %v329_v36 = vld [vmem:[#allocation7 + $0x68] sm:$0xff]  ;;  %v331_v39 = vld [vmem:[#allocation7 + $0x78] sm:$0xff]  ;;  %p845_p12 = por %p844_p9, %p843_p7 }
  0x73   : > { %v671_v37 = vpack.c.bf16 %v329_v36, %v328_v35  ;;  %v675_v40 = vpack.c.bf16 %v331_v39, %v330_v38 }
  0x74   : > { %654 = vmatpush3.bf16.msra.mxu1 %v651_v17  ;;  %p846_p1 = pnand %p845_p12, %p839_p3 }
  0x75   : > { %638 = vmatpush3.bf16.msra.mxu0 %v635_v12  ;;  %656 = vmatprep.subr.bf16.mxu1 %v655_v22 }
  0x76   : > { %640 = vmatprep.subr.bf16.mxu0 %v639_v20 }
  0x78   : > { %658 = vmatpush3.bf16.msra.mxu1 %v655_v22 }
  0x79   : > { %642 = vmatpush3.bf16.msra.mxu0 %v639_v20  ;;  %660 = vmatprep.subr.bf16.mxu1 %v659_v27 }
  0x7a   : > { %644 = vmatprep.subr.bf16.mxu0 %v643_v26 }
  0x7c   : > { %662 = vmatpush3.bf16.msra.mxu1 %v659_v27 }
  0x7d   : > { %646 = vmatpush3.bf16.msra.mxu0 %v643_v26  ;;  %664 = vmatprep.subr.bf16.mxu1 %v663_v30 }
  0x80   : > { %590 = vmatmul.mubr.msk.f32.vlgmr.msra.gmra.mrb[0].mxu0 %vm232_vm0, %v221_v33  ;;  %666 = vmatpush3.bf16.msra.mxu1 %v663_v30 }
  0x81   : > { %668 = vmatprep.subr.bf16.mxu1 %v667_v34 }
  0x84   : > { %670 = vmatpush3.bf16.msra.mxu1 %v667_v34 }
  0x85   : > { %672 = vmatprep.subr.bf16.mxu1 %v671_v37 }
  0x88   : > { %674 = vmatpush3.bf16.msra.mxu1 %v671_v37 }
  0x89   : > { %676 = vmatprep.subr.bf16.mxu1 %v675_v40 }
  0x8c   : > { %678 = vmatpush3.bf16.msra.mxu1 %v675_v40 }
 0x153   : > { %v591_v41 = vpop.f32.mrb[0].mxu0 }
 0x154   : > { %v305_v42 = vpop.f32.mrb[1].mxu0  ;;  %v315_v44 = vmax.f32 %v591_v41, 0.0 }
 0x155   : > { %v314_v43 = vmax.f32 %v305_v42, 0.0 }
 0x157   : > { %624 = vmatprep.mubr.f32.mxu1 %v314_v43 }
 0x158   : > { %625 = vmatmul.mubr.f32.vlgmr.msra.gmra.mrb[0].mxu1 %v315_v44 }
 0x22b   : > { %v626_v45 = vpop.f32.mrb[0].mxu1 }
 0x22c   : > { %v408_v46 = vmax.f32 %v626_v45, 0.0  ;;  %v398_v47 = vpop.f32.mrb[1].mxu1 }
 0x22d   : > { %v407_v48 = vmax.f32 %v398_v47, 0.0 }
 0x22e   : > { %410 = vst [vmem:[%s217_s18 + $0x8] sm:$0xff] %v408_v46 }
 0x22f   : > { %409 = vst [vmem:[%s217_s18] sm:$0xff] %v407_v48 }
 0x230   : > { %849 = shalt.err (!%p846_p1)
}
 0x231   : > { %s850_s10 = scalar_lea.hbm %s1145_s27, 256  ;;  %s854_s26 = scalar_lea.hbm %s1192_s3, 512 }
 0x232   : > { %p851_p13 = scmp.ne.s32.totalorder %s1145_s27, %s850_s10  ;;  %p855_p4 = scmp.lt.u32.totalorder %s1145_s27, %s1192_s3 }
 0x233   : > { %p856_p5 = scmp.lt.u32.totalorder %s854_s26, %s850_s10  ;;  %p858_p11 = scmp.lt.u32.totalorder %s850_s10, %s1145_s27 }
 0x234   : > { %p852_p6 = pnand %p851_p13, %p1206_p0 }
 0x235   : > { %p857_p8 = por %p856_p5, %p855_p4 }
 0x236   : > { %p853_p10 = pneg %p852_p6 }
 0x237   : > { %p859_p2 = por %p858_p11, %p857_p8 }
 0x239   : > { %p860_p3 = pnand %p859_p2, %p853_p10 }
 0x23b   : > { %863 = shalt.err (!%p860_p3)
}
 0x23c   : > { %s914_s28 = smov 128   ;;  %s915_s18 = smov 8  }
 0x23d   : > { %689 = dma.vmem_to_hbm [thread:$0]  (%p1206_p0), %s1140_s20, 256, %s1145_s27, %s412_s22, %s914_s28, %s914_s28, %s915_s18  }
 0x23e PF: > { %s440_s7 = sand.u32 1, %s894_s12   ;;  %p1207_p7 = scmp.ne.s32.totalorder %s1197_s19, 0 }
 0x23f   : > { %p1208_p9 = scmp.ge.s32.totalorder %s906_s15, 2  ;;  %s441_s8 = scalar_lea.sflag [#allocation4], %s440_s7 }
 0x241   : > { %p703_p12 = pnand %p1208_p9, %p1207_p7 }
 0x243   : > { %889 = dma.done.wait (!%p703_p12), %s441_s8, 256  }
 0x244   : > { %891 = vsyncadd (!%p703_p12), %s441_s8, 4294967040  ;;  %p17_p1 = scmp.ge.s32.totalorder %s1052_s23, 4   ;;  %s1209_s12 = smov %s898_s13 }
 0x245   : > { %s1210_s13 = smov %s902_s14  ;;  %s1211_s14 = smov %s1068_s9 }
 0x246   : > { %s1212_s15 = smov %s1052_s23  ;;  %19 = sbr.rel (!%p17_p1) target bundleno = 6 (0x6), region = 85 }
 0x24d   :  { %446 = vsyncpa [#allocation3], 1 }
 0x24e   :  { %448 = vsyncpa [#allocation3 + $0x1], 1 }
 0x24f   :  { %449 = vsyncpa [#allocation6], 1 }
 0x250   :  { %450 = vsyncpa [#allocation4], 1 }
 0x251   :  { %452 = vsyncpa [#allocation4 + $0x1], 1 }

</bundles_post_ra>
